<compile_context>
chip_gen: v6e
topology: v6e:2x2x1
jax: 0.10.0
libtpu: 0.0.40
codegen_flags: <defaults>
</compile_context>

<pallas_src>
import jax
import jax.numpy as jnp
from jax.experimental import pallas as pl
from jax.experimental.pallas import tpu as pltpu


def gcn_kernel(x_ref, w_ref, ablk_ref, b_ref, o_ref):
    # x_ref    : (fb*N, D_in)   -- fb feature slices, rows pre-flattened in wrapper
    # w_ref    : (D_in, D_out)  -- grid-invariant
    # ablk_ref : (fb*N, fb*N)   -- kron(I_fb, A): block-diagonal adjacency, grid-invariant
    # b_ref    : (1, D_out)     -- grid-invariant
    # o_ref    : (fb*N, D_out)
    support = jnp.dot(x_ref[...], w_ref[...],
                      preferred_element_type=jnp.float32)          # (fb*N, D_out)
    out = jnp.dot(ablk_ref[...], support,
                  preferred_element_type=jnp.float32)               # (fb*N, D_out)
    o_ref[...] = (out + b_ref[...]).astype(o_ref.dtype)             # one full-tile store


def _pick_feature_block(num_features, num_nodes, max_rows=256):
    """Pick fb | F such that:
       * fb*N <= max_rows (bounds vreg pressure and the kron(I,A) blow-up),
       * the grid has >= 2 steps when possible (v7x megacore + pipelining),
       * multi-step blocks keep fb*N a multiple of 8 (sublane alignment).
       Among legal choices prefer >=2 steps, then the largest block."""
    best = None  # (prefers_multi_step, rows, fb)
    for d in range(1, num_features + 1):
        if num_features % d:
            continue
        rows = d * num_nodes
        steps = num_features // d
        legal = (steps == 1) or (rows % 8 == 0)
        if not legal or rows > max_rows:
            continue
        key = (steps >= 2, rows)
        if best is None or key > best[:2]:
            best = (steps >= 2, rows, d)
    if best is None:
        # Nothing fits the row budget: fall back to a single full-extent step
        # (always BlockSpec-legal).  See TODO above for the large-graph path.
        return num_features
    return best[2]


def gcn_forward(adjacency, input_feature, weight, bias, num_cnn_feature):
    """adjacency: (N, N) dense; input_feature: any shape with F*N*D_in elements;
    weight: (D_in, D_out); bias: (D_out,)."""
    num_nodes = adjacency.shape[0]
    input_dim, output_dim = weight.shape
    num_features = int(num_cnn_feature)

    dt = jnp.float32
    # Pre-flatten x to a 2-D slab: contiguous DMA, no in-kernel reshape.
    x = jnp.reshape(input_feature, (num_features * num_nodes, input_dim)).astype(dt)
    a = adjacency.astype(dt)
    w = weight.astype(dt)
    b = jnp.reshape(bias, (1, output_dim)).astype(dt)

    fb = _pick_feature_block(num_features, num_nodes)
    grid = (num_features // fb,)
    rows = fb * num_nodes

    # Block-diagonal adjacency: fuses the fb per-feature A-matmuls into ONE MXU
    # call per grid step.  The extra zero FLOPs are free at these sizes (MXU
    # rows are nowhere near saturated with N << 128/256).
    a_blk = jnp.kron(jnp.eye(fb, dtype=dt), a) if fb > 1 else a

    out = pl.pallas_call(
        gcn_kernel,
        out_shape=jax.ShapeDtypeStruct((num_features * num_nodes, output_dim), dt),
        grid_spec=pltpu.PrefetchScalarGridSpec(
            num_scalar_prefetch=0,
            grid=grid,
            in_specs=[
                pl.BlockSpec((rows, input_dim), lambda g: (g, 0)),       # x slab (per step)
                pl.BlockSpec((input_dim, output_dim), lambda g: (0, 0)),  # W  (invariant)
                pl.BlockSpec((rows, rows), lambda g: (0, 0)),             # A_blk (invariant)
                pl.BlockSpec((1, output_dim), lambda g: (0, 0)),          # bias (invariant)
            ],
            out_specs=pl.BlockSpec((rows, output_dim), lambda g: (g, 0)),
        ),
        compiler_params=pltpu.CompilerParams(
            dimension_semantics=("parallel",),
            vmem_limit_bytes=32 * 1024 * 1024,
        ),
    )(x, w, a_blk, b)

    # torch: output.reshape(num_nodes, output_dim, num_cnn_feature).
    # out is (F*N, D_out) contiguous == (F, N, D_out) contiguous, so this plain
    # reshape reproduces the torch reshape exactly.
    return jnp.reshape(out, (num_nodes, output_dim, num_features))


def init_gcn_params(key, input_dim, output_dim):
    # kaiming_uniform_ default: a=0 => gain=sqrt(2), fan_in=input_dim,
    # bound = gain * sqrt(3 / fan_in) = sqrt(6 / fan_in)
    bound = (6.0 / input_dim) ** 0.5
    weight = jax.random.uniform(key, (input_dim, output_dim),
                                minval=-bound, maxval=bound, dtype=jnp.float32)
    bias = jnp.zeros((output_dim,), dtype=jnp.float32)
    return weight, bias


if __name__ == "__main__":
    key = jax.random.PRNGKey(0)
    k_w, k_x, k_a = jax.random.split(key, 3)

    num_cnn_feature = 4
    num_nodes = 8
    input_dim = 16
    output_dim = 32

    weight, bias = init_gcn_params(k_w, input_dim, output_dim)

    # input feature (any contiguous shape with F*N*D_in elements)
    input_feature = jax.random.normal(
        k_x, (num_cnn_feature * num_nodes, input_dim), dtype=jnp.float32)

    # dense "normalized adjacency" stand-in for torch.sparse.FloatTensor
    adjacency = jax.random.uniform(k_a, (num_nodes, num_nodes), dtype=jnp.float32)
    adjacency = adjacency / jnp.sum(adjacency, axis=1, keepdims=True)

    out = gcn_forward(adjacency, input_feature, weight, bias, num_cnn_feature)
    out = jax.block_until_ready(out)

    # reference check in plain JAX (same math as the torch module)
    x = input_feature.reshape(num_cnn_feature, num_nodes, input_dim)
    ref = jnp.einsum("nm,fmd->fnd", adjacency, x @ weight) + bias
    ref = ref.reshape(num_nodes, output_dim, num_cnn_feature)
    assert out.shape == (num_nodes, output_dim, num_cnn_feature)
    assert jnp.allclose(out, ref, atol=1e-5, rtol=1e-5)

    print("KERNEL_OK")
</pallas_src>

<mosaic_0001>
module attributes {stable_mosaic.version = 11 : i64} {
  func.func @gcn_kernel(%arg0: i32, %arg1: memref<16x16xf32, #tpu.memory_space<vmem>>, %arg2: memref<16x32xf32, #tpu.memory_space<vmem>>, %arg3: memref<16x16xf32, #tpu.memory_space<vmem>>, %arg4: memref<1x32xf32, #tpu.memory_space<vmem>>, %arg5: memref<16x32xf32, #tpu.memory_space<vmem>>) attributes {dimension_semantics = [#tpu.dimension_semantics<parallel>], iteration_bounds = array<i64: 2>, scalar_prefetch = 0 : i64, scratch_operands = 0 : i64, tpu.core_type = #tpu.core_type<tc>, window_params = [{transform_indices = @transform_0, window_bounds = array<i64: 16, 16>}, {pipeline_mode = #tpu.pipeline_mode<synchronous>, transform_indices = @transform_1, window_bounds = array<i64: 16, 32>}, {pipeline_mode = #tpu.pipeline_mode<synchronous>, transform_indices = @transform_2, window_bounds = array<i64: 16, 16>}, {pipeline_mode = #tpu.pipeline_mode<synchronous>, transform_indices = @transform_3, window_bounds = array<i64: 1, 32>}, {transform_indices = @transform_4, window_bounds = array<i64: 16, 32>}]} {
    %c0 = arith.constant 0 : index
    %c0_0 = arith.constant 0 : index
    %0 = vector.load %arg1[%c0, %c0_0] : memref<16x16xf32, #tpu.memory_space<vmem>>, vector<16x16xf32>
    %c0_1 = arith.constant 0 : index
    %c0_2 = arith.constant 0 : index
    %1 = vector.load %arg2[%c0_1, %c0_2] : memref<16x32xf32, #tpu.memory_space<vmem>>, vector<16x32xf32>
    %cst = arith.constant dense<0.000000e+00> : vector<16x32xf32>
    %2 = tpu.matmul %0, %1, %cst {dimension_numbers = #tpu.dot_dimension_numbers<[1], [0], [0], [1], [0, 0, 1, 1], [], []>} : vector<16x16xf32>, vector<16x32xf32>, vector<16x32xf32> -> vector<16x32xf32>
    %c0_3 = arith.constant 0 : index
    %c0_4 = arith.constant 0 : index
    %3 = vector.load %arg3[%c0_3, %c0_4] : memref<16x16xf32, #tpu.memory_space<vmem>>, vector<16x16xf32>
    %cst_5 = arith.constant dense<0.000000e+00> : vector<16x32xf32>
    %4 = tpu.matmul %3, %2, %cst_5 {dimension_numbers = #tpu.dot_dimension_numbers<[1], [0], [0], [1], [0, 0, 1, 1], [], []>} : vector<16x16xf32>, vector<16x32xf32>, vector<16x32xf32> -> vector<16x32xf32>
    %c0_6 = arith.constant 0 : index
    %c0_7 = arith.constant 0 : index
    %5 = vector.load %arg4[%c0_6, %c0_7] : memref<1x32xf32, #tpu.memory_space<vmem>>, vector<1x32xf32>
    %6 = vector.broadcast %5 : vector<1x32xf32> to vector<16x32xf32>
    %7 = arith.addf %4, %6 : vector<16x32xf32>
    %c0_8 = arith.constant 0 : index
    %c0_9 = arith.constant 0 : index
    %8 = vector.load %arg5[%c0_8, %c0_9] : memref<16x32xf32, #tpu.memory_space<vmem>>, vector<16x32xf32>
    tpu.vector_store %arg5[%c0_8, %c0_9], %7 {strides = array<i32>} : memref<16x32xf32, #tpu.memory_space<vmem>>, vector<16x32xf32>,
    return
  }
  func.func @transform_0(%arg0: i32) -> (i32, i32) {
    %c0_i32 = arith.constant 0 : i32
    %c0_i32_0 = arith.constant 0 : i32
    return %arg0, %c0_i32 : i32, i32
  }
  func.func @transform_1(%arg0: i32) -> (i32, i32) {
    %c0_i32 = arith.constant 0 : i32
    %c0_i32_0 = arith.constant 0 : i32
    %c0_i32_1 = arith.constant 0 : i32
    return %c0_i32, %c0_i32_0 : i32, i32
  }
  func.func @transform_2(%arg0: i32) -> (i32, i32) {
    %c0_i32 = arith.constant 0 : i32
    %c0_i32_0 = arith.constant 0 : i32
    %c0_i32_1 = arith.constant 0 : i32
    return %c0_i32, %c0_i32_0 : i32, i32
  }
  func.func @transform_3(%arg0: i32) -> (i32, i32) {
    %c0_i32 = arith.constant 0 : i32
    %c0_i32_0 = arith.constant 0 : i32
    %c0_i32_1 = arith.constant 0 : i32
    return %c0_i32, %c0_i32_0 : i32, i32
  }
  func.func @transform_4(%arg0: i32) -> (i32, i32) {
    %c0_i32 = arith.constant 0 : i32
    %c0_i32_0 = arith.constant 0 : i32
    return %arg0, %c0_i32 : i32, i32
  }
}

</mosaic_0001>

<bundles_post_ra>
// kernel: tpu_custom_call.1
= control target key start
LH: loop header
LB: loop body
LE: loop exit
PB: predicated region body
PF: predicated region fallthrough
CT: control target
= control target key end

     0   :  { %9 = vsyncpa [#allocation3], 0  ;;  %s741_s0 = inlined_call_operand.vmem [shape: f32[32,16], index: 0, kind: input, shape index: {}]   ;;  %s742_s1 = inlined_call_operand.vmem [shape: f32[16,32], index: 1, kind: input, shape index: {}]   ;;  %s743_s2 = inlined_call_operand.vmem [shape: f32[16,16], index: 2, kind: input, shape index: {}]   ;;  %s744_s3 = inlined_call_operand.vmem [shape: f32[1,32], index: 3, kind: input, shape index: {}]   ;;  %s745_s4 = inlined_call_operand.hbm [shape: f32[32,32], index: 4, kind: output, shape index: {}]  }
   0x1   :  { %11 = vsyncpa [#allocation3 + $0x1], 0  ;;  %s625_s15 = smov 0   ;;  %s627_s16 = smov 0  }
   0x2   :  { %s629_s17 = smov 0   ;;  %s631_s18 = smov 0  }
   0x3 LB: > { %s646_s19 = sadd.s32 4294967295, %s595_s18   ;;  %s454_s20 = sadd.s32 4294967294, %s595_s18   ;;  %s595_s18 = sphi %s631_s18, %s751_s18   ;;  %s591_s17 = sphi %s629_s17, %s750_s17   ;;  %s587_s16 = sphi %s627_s16, %s749_s16   ;;  %s583_s15 = sphi %s625_s15, %s748_s15  }
   0x4   : > { %s650_s21 = sadd.s32 1, %s595_s18   ;;  %s113_s22 = sadd.s32 1, %s591_s17 }
   0x5   : > { %s110_s23 = ssub.s32 %s595_s18, %s650_s21  ;;  %p123_p0 = scmp.ne.s32.totalorder %s591_s17, %s587_s16 }
   0x6   : > { %p111_p1 = scmp.eq.s32.totalorder %s110_s23, 0  ;;  %p124_p2 = scmp.eq.s32.totalorder %s646_s19, 1 }
   0x7   : > { %p129_p3 = scmp.ne.s32.totalorder %s587_s16, %s583_s15  ;;  %p130_p4 = scmp.eq.s32.totalorder %s454_s20, 1 }
   0x8   : > { %s661_s24 = scalar_select %p111_p1, %s591_s17, %s113_s22  }
   0x9   : > { %p663_p5 = por %p124_p2, %p123_p0  ;;  %p667_p6 = por %p130_p4, %p129_p3 }
   0xa   : > { %p457_p7 = scmp.ge.s32.totalorder %s595_s18, 1  ;;  %p166_p8 = scmp.lt.s32.totalorder %s595_s18, 3 }
   0xc   : > { %p167_p9 = pnand %p457_p7, %p166_p8 }
   0xd   : > { %s459_s5 = sshll.u32 (!%p167_p9), %s646_s19, 1  ;;  %s189_s14 = sand.u32 (!%p167_p9), 1, %s587_s16  }
   0xe   : > { %170 = sbr.rel (%p167_p9) target bundleno = 432 (0x1b0), region = 36  ;;  %p193_p10 = scmp.lt.s32.totalorder (!%p167_p9), %s459_s5, 3 }
   0xf   : > { %s458_s20 = sshll.u32 (!%p167_p9), %s189_s14, 4  ;;  %s471_s29 = sshll.u32 (!%p167_p9), %s646_s19, 8 }
  0x10   : > { %s191_s27 = scalar_lea.vmem (!%p167_p9), [#allocation2], %s458_s20  ;;  %s701_s7 = scalar_lea.sflag (!%p167_p9), [#allocation3], %s189_s14 }
  0x11   : > { %s392_s28 = sshll.u32 (!%p167_p9), %s191_s27, 4  ;;  %s597_s8 = smov (!%p167_p9), [#allocation2]   ;;  %s694_s28 = int_to_ptr.vmem [resolvable:$true] %s392_s28 }
  0x12   : > { %s535_s19 = scalar_lea.vmem (!%p167_p9), %s694_s28, 256 }
  0x13   : > { %v202_v0 = vld [vmem:[%s742_s1 + $0x8] sm:$0xff]  ;;  %v201_v1 = vld [vmem:[%s742_s1] sm:$0xff]  ;;  %s753_s5 = smov (!%p193_p10, %s459_s5), 3  ;;  %vm203_vm0 = vcmask 130048   ;;  %vm375_vm1 = vcmask 261120   ;;  %p536_p11 = scmp.ne.s32.totalorder %s694_s28, %s535_s19 }
  0x14   : > { %480 = vmatprep.subr.mxu0 %v202_v0  ;;  %s460_s6 = sshll.u32 %s753_s5, 3  ;;  %v285_v4 = vld [vmem:[%s743_s2] sm:$0xff]  ;;  %v286_v7 = vld [vmem:[%s743_s2 + $0x8] sm:$0xff] }
  0x15   : > { %481 = vmatpush3.msra.mxu0 %v202_v0  ;;  %s196_s9 = scalar_lea.vmem %s741_s0, %s460_s6  ;;  %491 = vmatprep.mubr.msk.f32.mxu1 %vm203_vm0, %v285_v4  ;;  %v463_v8 = vld [vmem:[%s744_s3] ss:$0 sm:$0xff]  ;;  %s699_s6 = scalar_lea.hbm %s745_s4, %s471_s29 }
  0x16   : > { %482 = vmatprep.subr.mxu0 %v201_v1  ;;  %v199_v2 = vld [vmem:[%s196_s9] sm:$0xff]  ;;  %v200_v3 = vld [vmem:[%s196_s9 + $0x8] sm:$0xff]  ;;  %p537_p12 = pnand %p536_p11, %p663_p5  ;;  %s539_s9 = sshll.u32 %s597_s8, 4  ;;  %s540_s9 = int_to_ptr.vmem [resolvable:$false] %s539_s9 }
  0x17   : > { %483 = vmatpush3.msra.mxu0 %v201_v1  ;;  %484 = vmatprep.mubr.msk.f32.mxu0 %vm203_vm0, %v199_v2  ;;  %s541_s10 = scalar_lea.vmem %s540_s9, 512  ;;  %p542_p0 = scmp.lt.s32.totalorder %s694_s28, %s540_s9 }
  0x18   : > { %485 = vmatmul.mubr.msk.f32.vlgmr.msra.gmra.mxu0 %vm203_vm0, %v200_v3  ;;  %p538_p13 = pneg %p537_p12  ;;  %p543_p1 = scmp.lt.s32.totalorder %s541_s10, %s535_s19 }
  0x1a   : > { %p544_p2 = por %p543_p1, %p542_p0 }
  0x1c   : > { %p545_p3 = pnand %p544_p2, %p538_p13 }
  0xd8   : > { %v486_v5 = vpop.f32.mrf.mxu0 }
  0xd9   : > { %487 = vmatprep.subr.mxu1 %v486_v5 }
  0xda   : > { %v276_v6 = vpop.f32.mrf.mxu0  ;;  %488 = vmatpush3.msra.mxu1 %v486_v5 }
  0xdb   : > { %489 = vmatprep.subr.mxu1 %v276_v6 }
  0xdc   : > { %490 = vmatpush3.msra.mxu1 %v276_v6 }
  0xdd   : > { %492 = vmatmul.mubr.msk.f32.vlgmr.msra.gmra.mxu1 %vm203_vm0, %v286_v7 }
 0x19d   : > { %v493_v9 = vpop.f32.mrf.mxu1 }
 0x19e   : > { %v372_v10 = vadd.f32 %v493_v9, %v463_v8 }
 0x19f   : > { %v366_v11 = vpop.f32.mrf.mxu1 }
 0x1a0   : > { %377 = vst.msk [vmem:[%s191_s27 + $0x8] sm:$0xff] %vm375_vm1, %v372_v10  ;;  %v367_v12 = vadd.f32 %v463_v8, %v366_v11 }
 0x1a2   : > { %376 = vst.msk [vmem:[%s191_s27] sm:$0xff] %vm375_vm1, %v367_v12 }
 0x1a3   : > { %548 = shalt.err (!%p545_p3)
}
 0x1a4   : > { %s549_s11 = scalar_lea.hbm %s699_s6, 256  ;;  %s553_s14 = scalar_lea.hbm %s745_s4, 512 }
 0x1a5   : > { %p550_p4 = scmp.ne.s32.totalorder %s699_s6, %s549_s11  ;;  %p554_p9 = scmp.lt.s32.totalorder %s699_s6, %s745_s4 }
 0x1a6   : > { %p555_p10 = scmp.lt.s32.totalorder %s553_s14, %s549_s11 }
 0x1a7   : > { %p551_p7 = pnand %p550_p4, %p663_p5 }
 0x1a8   : > { %p556_p11 = por %p555_p10, %p554_p9 }
 0x1a9   : > { %p552_p8 = pneg %p551_p7 }
 0x1ab   : > { %p557_p12 = pnand %p556_p11, %p552_p8 }
 0x1ad   : > { %560 = shalt.err (!%p557_p12)
}
 0x1ae   : > { %s598_s23 = smov 128   ;;  %s599_s27 = smov 8  }
 0x1af   : > { %494 = dma.vmem_to_hbm [thread:$0]  (%p663_p5), %s694_s28, 256, %s699_s6, %s701_s7, %s598_s23, %s598_s23, %s599_s27  }
 0x1b0 PF: > { %p500_p13 = scmp.ge.s32.totalorder %s595_s18, 2  ;;  %s407_s29 = sand.u32 1, %s583_s15  }
 0x1b1   : > { %s408_s30 = scalar_lea.sflag [#allocation3], %s407_s29 }
 0x1b2   : > { %p497_p0 = pnand %p500_p13, %p667_p6 }
 0x1b4   : > { %p498_p1 = pneg %p497_p0 }
 0x1b6   : > { %578 = dma.done.wait (%p498_p1), %s408_s30, 256  }
 0x1b7   : > { %580 = vsyncadd (%p498_p1), %s408_s30, 4294967040  ;;  %p14_p2 = scmp.ge.s32.totalorder %s650_s21, 4   ;;  %s748_s15 = smov %s587_s16 }
 0x1b8   : > { %s749_s16 = smov %s591_s17  ;;  %s750_s17 = smov %s661_s24 }
 0x1b9   : > { %s751_s18 = smov %s650_s21  ;;  %16 = sbr.rel (!%p14_p2) target bundleno = 3 (0x3), region = 71 }
 0x1be   :  { %413 = vsyncpa [#allocation3], 1 }
 0x1bf   :  { %415 = vsyncpa [#allocation3 + $0x1], 1 }

</bundles_post_ra>
